<compile_context>
chip_gen: v5e
topology: v5e:2x2
jax: 0.10.0
libtpu: 0.0.40
codegen_flags: <defaults>
</compile_context>

<pallas_src>
import numpy as np
import jax
import jax.numpy as jnp
from jax.experimental import pallas as pl
from jax.experimental.pallas import tpu as pltpu

BN_EPS = 1e-5
LANE = 128


def _pad_up(d, m=LANE):
    return ((int(d) + m - 1) // m) * m


def _has_bf16_vpu():
    try:
        kind = jax.devices()[0].device_kind.lower()
    except Exception:
        return True
    # v5e and older have no bf16 VPU; keep elementwise math in f32 there.
    return not any(t in kind for t in ("v2", "v3", "v4", "v5"))


def _vmem_capacity_bytes():
    try:
        info = pltpu.get_tpu_info()
        cap = int(getattr(info, "vmem_capacity_bytes", 0) or 0)
        if cap > 0:
            return cap
    except Exception:
        pass
    return 64 * 2 ** 20  # conservative default (v7x-sized)


# ---------------------------------------------------------------------------
# Fused kernel: whole network, whole batch resident in VMEM (no grid).
# ---------------------------------------------------------------------------
def _make_fused_kernel(cfg_padded, n_enc, input_dim, in_pad, bf16_act):
    """cfg_padded: tuple of (in_p, out_p, has_relu, has_bn) per linear layer."""
    n_layers = len(cfg_padded)
    needs_xpad = input_dim != in_pad

    def kernel(*refs):
        x_ref, w_ref, v_ref, z_ref, out_ref = refs[:5]
        batch = x_ref.shape[0]
        inv_n = 1.0 / float(batch)

        if needs_xpad:
            xpad_ref = refs[5]
            xpad_ref[...] = jnp.zeros_like(xpad_ref)
            xpad_ref[:, :input_dim] = x_ref[...]
            cur = xpad_ref[...]
        else:
            cur = x_ref[...]

        for li, (in_p, out_p, has_relu, has_bn) in enumerate(cfg_padded):
            is_last = li == n_layers - 1
            W = w_ref[li, :in_p, :out_p]                      # bf16
            b = v_ref[3 * li + 0:3 * li + 1, :out_p]          # f32 (1, out_p)
            lhs = cur if cur.dtype == jnp.bfloat16 else cur.astype(jnp.bfloat16)
            h32 = jnp.dot(lhs, W, preferred_element_type=jnp.float32) + b
            if has_relu:
                h32 = jnp.maximum(h32, 0.0)
            if has_bn:
                g = v_ref[3 * li + 1:3 * li + 2, :out_p]
                be = v_ref[3 * li + 2:3 * li + 3, :out_p]
                # Single reduction sweep; affine folded into scale/shift.
                s1 = jnp.sum(h32, axis=0, keepdims=True)
                s2 = jnp.sum(h32 * h32, axis=0, keepdims=True)
                mean = s1 * inv_n
                var = jnp.maximum(s2 * inv_n - mean * mean, 0.0)
                scale = g * jax.lax.rsqrt(var + BN_EPS)
                shift = be - mean * scale
                if bf16_act:
                    cur = (h32.astype(jnp.bfloat16) * scale.astype(jnp.bfloat16)
                           + shift.astype(jnp.bfloat16))
                else:
                    cur = h32 * scale + shift
            else:
                cur = h32.astype(jnp.bfloat16) if (bf16_act and not is_last) else h32
            if li == n_enc - 1:
                z_ref[...] = cur.astype(jnp.float32)
        out_ref[...] = cur.astype(jnp.float32)

    return kernel


# ---------------------------------------------------------------------------
# Staged kernel: one linear layer, batch-tile grid, streaming two-pass BN.
# ---------------------------------------------------------------------------
def _make_stage_kernel(*, in_width, has_prev_bn, has_relu, has_bn, writes_z,
                       batch, bf16_act, needs_xpad):
    def kernel(*refs):
        i = 0
        x_ref = refs[i]; i += 1
        ss_ref = None
        if has_prev_bn:
            ss_ref = refs[i]; i += 1
        w_ref = refs[i]; i += 1
        v_ref = refs[i]; i += 1
        h_ref = refs[i]; i += 1
        stats_ref = None
        if has_bn:
            stats_ref = refs[i]; i += 1
        z_ref = None
        if writes_z:
            z_ref = refs[i]; i += 1
        acc_ref = None
        if has_bn:
            acc_ref = refs[i]; i += 1
        if needs_xpad:
            xpad_ref = refs[i]; i += 1

        bt = pl.program_id(0)

        x = x_ref[...]
        if needs_xpad:
            xpad_ref[...] = jnp.zeros_like(xpad_ref)
            xpad_ref[:, :in_width] = x
            x = xpad_ref[...]
        if has_prev_bn:
            scale = ss_ref[0:1, :]
            shift = ss_ref[1:2, :]
            if bf16_act:
                x = x * scale.astype(jnp.bfloat16) + shift.astype(jnp.bfloat16)
            else:
                x = x * scale + shift
        if writes_z:
            z_ref[...] = x.astype(jnp.float32)

        lhs = x if x.dtype == jnp.bfloat16 else x.astype(jnp.bfloat16)
        b = v_ref[0:1, :]
        h32 = jnp.dot(lhs, w_ref[...], preferred_element_type=jnp.float32) + b
        if has_relu:
            h32 = jnp.maximum(h32, 0.0)

        if has_bn:
            @pl.when(bt == 0)
            def _():
                acc_ref[...] = jnp.zeros_like(acc_ref)

            acc_ref[0:1, :] += jnp.sum(h32, axis=0, keepdims=True)
            acc_ref[1:2, :] += jnp.sum(h32 * h32, axis=0, keepdims=True)

            @pl.when(bt == pl.num_programs(0) - 1)
            def _():
                inv_n = 1.0 / float(batch)
                mean = acc_ref[0:1, :] * inv_n
                var = jnp.maximum(acc_ref[1:2, :] * inv_n - mean * mean, 0.0)
                g = v_ref[1:2, :]
                be = v_ref[2:3, :]
                sc = g * jax.lax.rsqrt(var + BN_EPS)
                stats_ref[0:1, :] = sc
                stats_ref[1:2, :] = be - mean * sc

        h_ref[...] = h32.astype(h_ref.dtype)

    return kernel


# ---------------------------------------------------------------------------
# Model wrapper (mirrors the PyTorch AutoEncoder forward pass).
# ---------------------------------------------------------------------------
class AutoEncoderPallas:
    def __init__(self, input_dim, hidden_dims, latent_dim, n_clusters, key):
        hidden_dims = list(hidden_dims) + [latent_dim]  # matches .append(latent_dim)
        self.input_dim = int(input_dim)
        self.output_dim = int(input_dim)
        self.hidden_dims = hidden_dims
        self.latent_dim = int(latent_dim)
        self.n_clusters = n_clusters
        dims_list = hidden_dims + hidden_dims[:-1][::-1]
        self.n_layers = len(dims_list)
        assert self.n_layers % 2 > 0
        assert dims_list[self.n_layers // 2] == self.latent_dim

        # (fan_in, fan_out, relu, bn) per linear layer, forward order.
        layers = []
        for idx, hd in enumerate(hidden_dims):          # encoder
            if idx == 0:
                layers.append((self.input_dim, hd, True, False))
            else:
                layers.append((hidden_dims[idx - 1], hd, True, True))
        tmp = hidden_dims[::-1]
        for idx, hd in enumerate(tmp):                  # decoder
            if idx == len(tmp) - 1:
                layers.append((hd, self.output_dim, False, False))
            else:
                layers.append((tmp[idx], tmp[idx + 1], True, True))
        self.layers = layers
        self.n_encoder_layers = len(hidden_dims)
        self.n_linear = len(layers)

        self._in_pad = _pad_up(self.input_dim)
        self._lat_pad = _pad_up(self.latent_dim)
        self._out_pad = _pad_up(self.output_dim)
        self._cfg_padded = tuple((_pad_up(fin), _pad_up(fout), relu, bn)
                                 for (fin, fout, relu, bn) in layers)
        self._max_in_p = max(c[0] for c in self._cfg_padded)
        self._max_out_p = max(c[1] for c in self._cfg_padded)

        self._bf16_act = _has_bf16_vpu()
        self._act_dtype = jnp.bfloat16 if self._bf16_act else jnp.float32
        self._vmem_cap = _vmem_capacity_bytes()
        self._vmem_budget = int(0.7 * self._vmem_cap)

        # PyTorch-style init: U(-1/sqrt(fan_in), 1/sqrt(fan_in)); every feature
        # dim zero-padded to a multiple of 128 lanes (gamma padded with zeros so
        # padded columns stay exactly zero through BN).
        W_list, vec_list = [], []
        flops_per_row = 0
        transcendentals = 0
        for (fin, fout, relu, bn), (in_p, out_p, _, _) in zip(layers, self._cfg_padded):
            key, k_w, k_b = jax.random.split(key, 3)
            bound = 1.0 / float(np.sqrt(fin))
            W = jax.random.uniform(k_w, (fout, fin), jnp.float32, -bound, bound)
            b = jax.random.uniform(k_b, (fout,), jnp.float32, -bound, bound)
            W_p = jnp.zeros((in_p, out_p), jnp.float32).at[:fin, :fout].set(W.T)
            vec = jnp.zeros((3, out_p), jnp.float32).at[0, :fout].set(b)
            if bn:
                vec = vec.at[1, :fout].set(1.0)   # gamma; beta row stays 0
                transcendentals += out_p
            W_list.append(W_p.astype(jnp.bfloat16))
            vec_list.append(vec)
            flops_per_row += 2 * in_p * out_p
        self._W_list = tuple(W_list)
        self._vec_list = tuple(vec_list)
        self._flops_per_row = flops_per_row
        self._transcendentals = transcendentals

        # Packed slabs for the fused path (2 descriptors instead of ~4/layer).
        Wpack = jnp.zeros((self.n_linear, self._max_in_p, self._max_out_p),
                          jnp.bfloat16)
        Vpack = jnp.zeros((3 * self.n_linear, self._max_out_p), jnp.float32)
        for li, ((in_p, out_p, _, _), W_p, vec) in enumerate(
                zip(self._cfg_padded, W_list, vec_list)):
            Wpack = Wpack.at[li, :in_p, :out_p].set(W_p)
            Vpack = Vpack.at[3 * li:3 * li + 3, :out_p].set(vec)
        self._Wpack = Wpack
        self._Vpack = Vpack
        self._param_bytes = int(Wpack.size) * 2 + int(Vpack.size) * 4

        self._fused_kernel = _make_fused_kernel(
            self._cfg_padded, self.n_encoder_layers, self.input_dim,
            self._in_pad, self._bf16_act)
        self._fused_jit = jax.jit(self._fused_forward)
        self._staged_jit = jax.jit(self._staged_forward, static_argnames=("tile",))

    # -------------------------- fused path --------------------------------
    def _fused_vmem_need(self, batch):
        act = batch * (4 * self._in_pad + 4 * self.input_dim
                       + 8 * self._max_out_p          # two live f32 activations
                       + 4 * self._max_out_p          # bf16 copies / headroom
                       + 4 * self._lat_pad + 4 * self._out_pad)
        return int(1.25 * (self._param_bytes + act)) + (2 << 20)

    def _fused_forward(self, X, Wpack, Vpack):
        batch = X.shape[0]
        need = self._fused_vmem_need(batch)
        vmem_limit = int(min(self._vmem_budget, max(need, 8 << 20)))
        cost = pl.CostEstimate(
            flops=batch * self._flops_per_row,
            transcendentals=self._transcendentals,
            bytes_accessed=int(self._param_bytes
                               + 4 * batch * (self.input_dim + self._lat_pad
                                              + self._out_pad)))
        vmem_spec = pl.BlockSpec(memory_space=pltpu.MemorySpace.VMEM)
        scratch = []
        if self.input_dim != self._in_pad:
            scratch.append(pltpu.VMEM((batch, self._in_pad), jnp.float32))
        z_p, out_p = pl.pallas_call(
            self._fused_kernel,
            out_shape=(jax.ShapeDtypeStruct((batch, self._lat_pad), jnp.float32),
                       jax.ShapeDtypeStruct((batch, self._out_pad), jnp.float32)),
            in_specs=[vmem_spec, vmem_spec, vmem_spec],
            out_specs=(vmem_spec, vmem_spec),
            scratch_shapes=scratch,
            compiler_params=pltpu.CompilerParams(vmem_limit_bytes=vmem_limit),
            cost_estimate=cost,
        )(X.astype(jnp.float32), Wpack, Vpack)
        return z_p[:, :self.latent_dim], out_p[:, :self.output_dim]

    # -------------------------- staged path -------------------------------
    @staticmethod
    def _pick_batch_tile(batch, min_mult):
        for t in (512, 256, 128, 64, 32, 16, 8):
            if t % min_mult == 0 and batch % t == 0 and t <= batch:
                return t
        return batch

    def _staged_forward(self, X, W_list, vec_list, tile=None):
        batch = X.shape[0]
        min_mult = 16 if self._bf16_act else 8
        if tile is None:
            tile = self._pick_batch_tile(batch, min_mult)
        assert batch % tile == 0
        nbt = batch // tile
        act_dt = self._act_dtype

        h = X.astype(jnp.float32)
        prev_ss = None
        prev_bn = False
        z = None
        for li, ((in_p, out_p, has_relu, has_bn), W, vec) in enumerate(
                zip(self._cfg_padded, W_list, vec_list)):
            is_first = li == 0
            is_last = li == self.n_linear - 1
            writes_z = li == self.n_encoder_layers
            in_width = h.shape[1]
            needs_xpad = is_first and (in_width != in_p)

            kernel = _make_stage_kernel(
                in_width=in_width, has_prev_bn=prev_bn, has_relu=has_relu,
                has_bn=has_bn, writes_z=writes_z, batch=batch,
                bf16_act=self._bf16_act, needs_xpad=needs_xpad)

            in_specs = [pl.BlockSpec((tile, in_width), lambda i: (i, 0))]
            inputs = [h]
            if prev_bn:
                in_specs.append(pl.BlockSpec((2, in_p), lambda i: (0, 0)))
                inputs.append(prev_ss)
            in_specs += [pl.BlockSpec((in_p, out_p), lambda i: (0, 0)),
                         pl.BlockSpec((3, out_p), lambda i: (0, 0))]
            inputs += [W, vec]

            h_dtype = jnp.float32 if is_last else act_dt
            out_shape = [jax.ShapeDtypeStruct((batch, out_p), h_dtype)]
            out_specs = [pl.BlockSpec((tile, out_p), lambda i: (i, 0))]
            if has_bn:
                out_shape.append(jax.ShapeDtypeStruct((2, out_p), jnp.float32))
                out_specs.append(pl.BlockSpec((2, out_p), lambda i: (0, 0)))
            if writes_z:
                out_shape.append(jax.ShapeDtypeStruct((batch, self._lat_pad),
                                                      jnp.float32))
                out_specs.append(pl.BlockSpec((tile, self._lat_pad),
                                              lambda i: (i, 0)))

            scratch = []
            if has_bn:
                scratch.append(pltpu.VMEM((2, out_p), jnp.float32))
            if needs_xpad:
                scratch.append(pltpu.VMEM((tile, in_p), jnp.float32))

            sem = "arbitrary" if has_bn else "parallel"
            results = pl.pallas_call(
                kernel,
                grid=(nbt,),
                out_shape=tuple(out_shape),
                in_specs=in_specs,
                out_specs=tuple(out_specs),
                scratch_shapes=scratch,
                compiler_params=pltpu.CompilerParams(
                    dimension_semantics=(sem,)),
            )(*inputs)
            if not isinstance(results, (tuple, list)):
                results = (results,)
            r = list(results)
            h = r.pop(0)
            prev_ss = r.pop(0) if has_bn else None
            if writes_z:
                z = r.pop(0)
            prev_bn = has_bn

        return z[:, :self.latent_dim], h[:, :self.output_dim]

    # -------------------------- public API --------------------------------
    def forward_both(self, X, force_staged=False, tile=None):
        batch = X.shape[0]
        if force_staged or self._fused_vmem_need(batch) > self._vmem_budget:
            return self._staged_jit(X, self._W_list, self._vec_list, tile=tile)
        return self._fused_jit(X, self._Wpack, self._Vpack)

    def __call__(self, X, latent=False):
        z, out = self.forward_both(X)
        return z if latent else out


# ---------------------------------------------------------------------------
# Pure-JAX reference mirroring the kernels' math (for verification only).
# ---------------------------------------------------------------------------
def reference_forward_both(model, X):
    h = jnp.pad(X.astype(jnp.float32),
                ((0, 0), (0, model._in_pad - model.input_dim)))
    z = None
    for li, ((in_p, out_p, has_relu, has_bn), W, vec) in enumerate(
            zip(model._cfg_padded, model._W_list, model._vec_list)):
        lhs = h if h.dtype == jnp.bfloat16 else h.astype(jnp.bfloat16)
        h32 = jnp.dot(lhs, W, preferred_element_type=jnp.float32) + vec[0:1, :]
        if has_relu:
            h32 = jnp.maximum(h32, 0.0)
        if has_bn:
            n = h32.shape[0]
            s1 = jnp.sum(h32, axis=0, keepdims=True)
            s2 = jnp.sum(h32 * h32, axis=0, keepdims=True)
            mean = s1 / n
            var = jnp.maximum(s2 / n - mean * mean, 0.0)
            scale = vec[1:2, :] * jax.lax.rsqrt(var + BN_EPS)
            shift = vec[2:3, :] - mean * scale
            if model._bf16_act:
                h = (h32.astype(jnp.bfloat16) * scale.astype(jnp.bfloat16)
                     + shift.astype(jnp.bfloat16))
            else:
                h = h32 * scale + shift
        else:
            if model._bf16_act and li != model.n_linear - 1:
                h = h32.astype(jnp.bfloat16)
            else:
                h = h32
        if li == model.n_encoder_layers - 1:
            z = h.astype(jnp.float32)
    return z[:, :model.latent_dim], h[:, :model.output_dim]


if __name__ == "__main__":
    key = jax.random.PRNGKey(0)
    key, k_param, k_x1, k_x2 = jax.random.split(key, 4)

    # Small config: input_dim=16, hidden_dims=[32,16], latent_dim=8, n_clusters=4.
    model = AutoEncoderPallas(input_dim=16, hidden_dims=[32, 16], latent_dim=8,
                              n_clusters=4, key=k_param)

    # --- fused path: whole batch VMEM-resident, single pallas_call ---
    X = jax.random.normal(k_x1, (8, 16), dtype=jnp.float32)
    z, out = model.forward_both(X)
    z, out = jax.block_until_ready(z), jax.block_until_ready(out)
    ref_z, ref_out = reference_forward_both(model, X)
    np.testing.assert_allclose(np.asarray(out), np.asarray(ref_out),
                               rtol=1e-2, atol=1e-2)
    np.testing.assert_allclose(np.asarray(z), np.asarray(ref_z),
                               rtol=1e-2, atol=1e-2)

    # --- staged path: batch grid + streaming two-pass BatchNorm (forced) ---
    X2 = jax.random.normal(k_x2, (64, 16), dtype=jnp.float32)
    z2, out2 = model.forward_both(X2, force_staged=True, tile=16)
    z2, out2 = jax.block_until_ready(z2), jax.block_until_ready(out2)
    ref_z2, ref_out2 = reference_forward_both(model, X2)
    np.testing.assert_allclose(np.asarray(out2), np.asarray(ref_out2),
                               rtol=1e-2, atol=1e-2)
    np.testing.assert_allclose(np.asarray(z2), np.asarray(ref_z2),
                               rtol=1e-2, atol=1e-2)

    # nn.Module-style call reuses the cached jitted path.
    out_again = jax.block_until_ready(model(X))
    z_again = jax.block_until_ready(model(X, latent=True))
    np.testing.assert_allclose(np.asarray(out_again), np.asarray(out),
                               rtol=1e-6, atol=1e-6)
    np.testing.assert_allclose(np.asarray(z_again), np.asarray(z),
                               rtol=1e-6, atol=1e-6)

    print("KERNEL_OK")
</pallas_src>

<mosaic_0001>
module attributes {stable_mosaic.version = 11 : i64} {
  func.func @kernel(%arg0: memref<8x16xf32, #tpu.memory_space<vmem>>, %arg1: memref<6x128x128xbf16, #tpu.memory_space<vmem>>, %arg2: memref<18x128xf32, #tpu.memory_space<vmem>>, %arg3: memref<8x128xf32, #tpu.memory_space<vmem>>, %arg4: memref<8x128xf32, #tpu.memory_space<vmem>>, %arg5: memref<8x128xf32, #tpu.memory_space<vmem>>) attributes {dimension_semantics = [], scalar_prefetch = 0 : i64, scratch_operands = 1 : i64, tpu.core_type = #tpu.core_type<tc>} {
    %cst = arith.constant 0.000000e+00 : f32
    %0 = vector.broadcast %cst : f32 to vector<8x128xf32>
    %c0 = arith.constant 0 : index
    %c0_0 = arith.constant 0 : index
    %1 = vector.load %arg5[%c0, %c0_0] : memref<8x128xf32, #tpu.memory_space<vmem>>, vector<8x128xf32>
    tpu.vector_store %arg5[%c0, %c0_0], %0 {strides = array<i32>} : memref<8x128xf32, #tpu.memory_space<vmem>>, vector<8x128xf32>,
    %c0_1 = arith.constant 0 : index
    %c0_2 = arith.constant 0 : index
    %2 = vector.load %arg0[%c0_1, %c0_2] : memref<8x16xf32, #tpu.memory_space<vmem>>, vector<8x16xf32>
    %c0_3 = arith.constant 0 : index
    %c0_4 = arith.constant 0 : index
    %3 = vector.load %arg5[%c0_3, %c0_4] : memref<8x128xf32, #tpu.memory_space<vmem>>, vector<8x16xf32>
    tpu.vector_store %arg5[%c0_3, %c0_4], %2 {strides = array<i32>} : memref<8x128xf32, #tpu.memory_space<vmem>>, vector<8x16xf32>,
    %c0_5 = arith.constant 0 : index
    %c0_6 = arith.constant 0 : index
    %4 = vector.load %arg5[%c0_5, %c0_6] : memref<8x128xf32, #tpu.memory_space<vmem>>, vector<8x128xf32>
    %c0_7 = arith.constant 0 : index
    %c0_8 = arith.constant 0 : index
    %c0_9 = arith.constant 0 : index
    %5 = vector.load %arg1[%c0_7, %c0_8, %c0_9] : memref<6x128x128xbf16, #tpu.memory_space<vmem>>, vector<1x128x128xbf16>
    %6 = vector.shape_cast %5 : vector<1x128x128xbf16> to vector<128x128xbf16>
    %c0_10 = arith.constant 0 : index
    %c0_11 = arith.constant 0 : index
    %7 = vector.load %arg2[%c0_10, %c0_11] : memref<18x128xf32, #tpu.memory_space<vmem>>, vector<1x128xf32>
    %8 = arith.truncf %4 : vector<8x128xf32> to vector<8x128xbf16>
    %cst_12 = arith.constant dense<0.000000e+00> : vector<8x128xf32>
    %9 = tpu.matmul %8, %6, %cst_12 {dimension_numbers = #tpu.dot_dimension_numbers<[1], [0], [0], [1], [0, 0, 1, 1], [], []>} : vector<8x128xbf16>, vector<128x128xbf16>, vector<8x128xf32> -> vector<8x128xf32>
    %10 = vector.broadcast %7 : vector<1x128xf32> to vector<8x128xf32>
    %11 = arith.addf %9, %10 : vector<8x128xf32>
    %cst_13 = arith.constant 0.000000e+00 : f32
    %12 = vector.broadcast %cst_13 : f32 to vector<8x128xf32>
    %13 = arith.maximumf %11, %12 : vector<8x128xf32>
    %14 = arith.truncf %13 : vector<8x128xf32> to vector<8x128xbf16>
    %c1 = arith.constant 1 : index
    %c0_14 = arith.constant 0 : index
    %c0_15 = arith.constant 0 : index
    %15 = vector.load %arg1[%c1, %c0_14, %c0_15] : memref<6x128x128xbf16, #tpu.memory_space<vmem>>, vector<1x128x128xbf16>
    %16 = vector.shape_cast %15 : vector<1x128x128xbf16> to vector<128x128xbf16>
    %c3 = arith.constant 3 : index
    %c0_16 = arith.constant 0 : index
    %17 = vector.load %arg2[%c3, %c0_16] : memref<18x128xf32, #tpu.memory_space<vmem>>, vector<1x128xf32>
    %cst_17 = arith.constant dense<0.000000e+00> : vector<8x128xf32>
    %18 = tpu.matmul %14, %16, %cst_17 {dimension_numbers = #tpu.dot_dimension_numbers<[1], [0], [0], [1], [0, 0, 1, 1], [], []>} : vector<8x128xbf16>, vector<128x128xbf16>, vector<8x128xf32> -> vector<8x128xf32>
    %19 = vector.broadcast %17 : vector<1x128xf32> to vector<8x128xf32>
    %20 = arith.addf %18, %19 : vector<8x128xf32>
    %cst_18 = arith.constant 0.000000e+00 : f32
    %21 = vector.broadcast %cst_18 : f32 to vector<8x128xf32>
    %22 = arith.maximumf %20, %21 : vector<8x128xf32>
    %c4 = arith.constant 4 : index
    %c0_19 = arith.constant 0 : index
    %23 = vector.load %arg2[%c4, %c0_19] : memref<18x128xf32, #tpu.memory_space<vmem>>, vector<1x128xf32>
    %c5 = arith.constant 5 : index
    %c0_20 = arith.constant 0 : index
    %24 = vector.load %arg2[%c5, %c0_20] : memref<18x128xf32, #tpu.memory_space<vmem>>, vector<1x128xf32>
    %cst_21 = arith.constant dense<0.000000e+00> : vector<128xf32>
    %25 = vector.multi_reduction <add>, %22, %cst_21 [0] : vector<8x128xf32> to vector<128xf32>
    %26 = vector.shape_cast %25 : vector<128xf32> to vector<1x128xf32>
    %27 = arith.mulf %22, %22 : vector<8x128xf32>
    %cst_22 = arith.constant dense<0.000000e+00> : vector<128xf32>
    %28 = vector.multi_reduction <add>, %27, %cst_22 [0] : vector<8x128xf32> to vector<128xf32>
    %29 = vector.shape_cast %28 : vector<128xf32> to vector<1x128xf32>
    %cst_23 = arith.constant 1.250000e-01 : f32
    %30 = vector.broadcast %cst_23 : f32 to vector<1x128xf32>
    %31 = arith.mulf %26, %30 : vector<1x128xf32>
    %cst_24 = arith.constant 1.250000e-01 : f32
    %32 = vector.broadcast %cst_24 : f32 to vector<1x128xf32>
    %33 = arith.mulf %29, %32 : vector<1x128xf32>
    %34 = arith.mulf %31, %31 : vector<1x128xf32>
    %35 = arith.subf %33, %34 : vector<1x128xf32>
    %cst_25 = arith.constant 0.000000e+00 : f32
    %36 = vector.broadcast %cst_25 : f32 to vector<1x128xf32>
    %37 = arith.maximumf %35, %36 : vector<1x128xf32>
    %cst_26 = arith.constant 9.99999974E-6 : f32
    %38 = vector.broadcast %cst_26 : f32 to vector<1x128xf32>
    %39 = arith.addf %37, %38 : vector<1x128xf32>
    %40 = math.rsqrt %39 : vector<1x128xf32>
    %41 = arith.mulf %23, %40 : vector<1x128xf32>
    %42 = arith.mulf %31, %41 : vector<1x128xf32>
    %43 = arith.subf %24, %42 : vector<1x128xf32>
    %44 = arith.truncf %22 : vector<8x128xf32> to vector<8x128xbf16>
    %45 = arith.truncf %41 : vector<1x128xf32> to vector<1x128xbf16>
    %46 = vector.broadcast %45 : vector<1x128xbf16> to vector<8x128xbf16>
    %47 = arith.mulf %44, %46 : vector<8x128xbf16>
    %48 = arith.truncf %43 : vector<1x128xf32> to vector<1x128xbf16>
    %49 = vector.broadcast %48 : vector<1x128xbf16> to vector<8x128xbf16>
    %50 = arith.addf %47, %49 : vector<8x128xbf16>
    %c2 = arith.constant 2 : index
    %c0_27 = arith.constant 0 : index
    %c0_28 = arith.constant 0 : index
    %51 = vector.load %arg1[%c2, %c0_27, %c0_28] : memref<6x128x128xbf16, #tpu.memory_space<vmem>>, vector<1x128x128xbf16>
    %52 = vector.shape_cast %51 : vector<1x128x128xbf16> to vector<128x128xbf16>
    %c6 = arith.constant 6 : index
    %c0_29 = arith.constant 0 : index
    %53 = vector.load %arg2[%c6, %c0_29] : memref<18x128xf32, #tpu.memory_space<vmem>>, vector<1x128xf32>
    %cst_30 = arith.constant dense<0.000000e+00> : vector<8x128xf32>
    %54 = tpu.matmul %50, %52, %cst_30 {dimension_numbers = #tpu.dot_dimension_numbers<[1], [0], [0], [1], [0, 0, 1, 1], [], []>} : vector<8x128xbf16>, vector<128x128xbf16>, vector<8x128xf32> -> vector<8x128xf32>
    %55 = vector.broadcast %53 : vector<1x128xf32> to vector<8x128xf32>
    %56 = arith.addf %54, %55 : vector<8x128xf32>
    %cst_31 = arith.constant 0.000000e+00 : f32
    %57 = vector.broadcast %cst_31 : f32 to vector<8x128xf32>
    %58 = arith.maximumf %56, %57 : vector<8x128xf32>
    %c7 = arith.constant 7 : index
    %c0_32 = arith.constant 0 : index
    %59 = vector.load %arg2[%c7, %c0_32] : memref<18x128xf32, #tpu.memory_space<vmem>>, vector<1x128xf32>
    %c8 = arith.constant 8 : index
    %c0_33 = arith.constant 0 : index
    %60 = vector.load %arg2[%c8, %c0_33] : memref<18x128xf32, #tpu.memory_space<vmem>>, vector<1x128xf32>
    %cst_34 = arith.constant dense<0.000000e+00> : vector<128xf32>
    %61 = vector.multi_reduction <add>, %58, %cst_34 [0] : vector<8x128xf32> to vector<128xf32>
    %62 = vector.shape_cast %61 : vector<128xf32> to vector<1x128xf32>
    %63 = arith.mulf %58, %58 : vector<8x128xf32>
    %cst_35 = arith.constant dense<0.000000e+00> : vector<128xf32>
    %64 = vector.multi_reduction <add>, %63, %cst_35 [0] : vector<8x128xf32> to vector<128xf32>
    %65 = vector.shape_cast %64 : vector<128xf32> to vector<1x128xf32>
    %cst_36 = arith.constant 1.250000e-01 : f32
    %66 = vector.broadcast %cst_36 : f32 to vector<1x128xf32>
    %67 = arith.mulf %62, %66 : vector<1x128xf32>
    %cst_37 = arith.constant 1.250000e-01 : f32
    %68 = vector.broadcast %cst_37 : f32 to vector<1x128xf32>
    %69 = arith.mulf %65, %68 : vector<1x128xf32>
    %70 = arith.mulf %67, %67 : vector<1x128xf32>
    %71 = arith.subf %69, %70 : vector<1x128xf32>
    %cst_38 = arith.constant 0.000000e+00 : f32
    %72 = vector.broadcast %cst_38 : f32 to vector<1x128xf32>
    %73 = arith.maximumf %71, %72 : vector<1x128xf32>
    %cst_39 = arith.constant 9.99999974E-6 : f32
    %74 = vector.broadcast %cst_39 : f32 to vector<1x128xf32>
    %75 = arith.addf %73, %74 : vector<1x128xf32>
    %76 = math.rsqrt %75 : vector<1x128xf32>
    %77 = arith.mulf %59, %76 : vector<1x128xf32>
    %78 = arith.mulf %67, %77 : vector<1x128xf32>
    %79 = arith.subf %60, %78 : vector<1x128xf32>
    %80 = arith.truncf %58 : vector<8x128xf32> to vector<8x128xbf16>
    %81 = arith.truncf %77 : vector<1x128xf32> to vector<1x128xbf16>
    %82 = vector.broadcast %81 : vector<1x128xbf16> to vector<8x128xbf16>
    %83 = arith.mulf %80, %82 : vector<8x128xbf16>
    %84 = arith.truncf %79 : vector<1x128xf32> to vector<1x128xbf16>
    %85 = vector.broadcast %84 : vector<1x128xbf16> to vector<8x128xbf16>
    %86 = arith.addf %83, %85 : vector<8x128xbf16>
    %87 = arith.extf %86 : vector<8x128xbf16> to vector<8x128xf32>
    %c0_40 = arith.constant 0 : index
    %c0_41 = arith.constant 0 : index
    %88 = vector.load %arg3[%c0_40, %c0_41] : memref<8x128xf32, #tpu.memory_space<vmem>>, vector<8x128xf32>
    tpu.vector_store %arg3[%c0_40, %c0_41], %87 {strides = array<i32>} : memref<8x128xf32, #tpu.memory_space<vmem>>, vector<8x128xf32>,
    %c3_42 = arith.constant 3 : index
    %c0_43 = arith.constant 0 : index
    %c0_44 = arith.constant 0 : index
    %89 = vector.load %arg1[%c3_42, %c0_43, %c0_44] : memref<6x128x128xbf16, #tpu.memory_space<vmem>>, vector<1x128x128xbf16>
    %90 = vector.shape_cast %89 : vector<1x128x128xbf16> to vector<128x128xbf16>
    %c9 = arith.constant 9 : index
    %c0_45 = arith.constant 0 : index
    %91 = vector.load %arg2[%c9, %c0_45] : memref<18x128xf32, #tpu.memory_space<vmem>>, vector<1x128xf32>
    %cst_46 = arith.constant dense<0.000000e+00> : vector<8x128xf32>
    %92 = tpu.matmul %86, %90, %cst_46 {dimension_numbers = #tpu.dot_dimension_numbers<[1], [0], [0], [1], [0, 0, 1, 1], [], []>} : vector<8x128xbf16>, vector<128x128xbf16>, vector<8x128xf32> -> vector<8x128xf32>
    %93 = vector.broadcast %91 : vector<1x128xf32> to vector<8x128xf32>
    %94 = arith.addf %92, %93 : vector<8x128xf32>
    %cst_47 = arith.constant 0.000000e+00 : f32
    %95 = vector.broadcast %cst_47 : f32 to vector<8x128xf32>
    %96 = arith.maximumf %94, %95 : vector<8x128xf32>
    %c10 = arith.constant 10 : index
    %c0_48 = arith.constant 0 : index
    %97 = vector.load %arg2[%c10, %c0_48] : memref<18x128xf32, #tpu.memory_space<vmem>>, vector<1x128xf32>
    %c11 = arith.constant 11 : index
    %c0_49 = arith.constant 0 : index
    %98 = vector.load %arg2[%c11, %c0_49] : memref<18x128xf32, #tpu.memory_space<vmem>>, vector<1x128xf32>
    %cst_50 = arith.constant dense<0.000000e+00> : vector<128xf32>
    %99 = vector.multi_reduction <add>, %96, %cst_50 [0] : vector<8x128xf32> to vector<128xf32>
    %100 = vector.shape_cast %99 : vector<128xf32> to vector<1x128xf32>
    %101 = arith.mulf %96, %96 : vector<8x128xf32>
    %cst_51 = arith.constant dense<0.000000e+00> : vector<128xf32>
    %102 = vector.multi_reduction <add>, %101, %cst_51 [0] : vector<8x128xf32> to vector<128xf32>
    %103 = vector.shape_cast %102 : vector<128xf32> to vector<1x128xf32>
    %cst_52 = arith.constant 1.250000e-01 : f32
    %104 = vector.broadcast %cst_52 : f32 to vector<1x128xf32>
    %105 = arith.mulf %100, %104 : vector<1x128xf32>
    %cst_53 = arith.constant 1.250000e-01 : f32
    %106 = vector.broadcast %cst_53 : f32 to vector<1x128xf32>
    %107 = arith.mulf %103, %106 : vector<1x128xf32>
    %108 = arith.mulf %105, %105 : vector<1x128xf32>
    %109 = arith.subf %107, %108 : vector<1x128xf32>
    %cst_54 = arith.constant 0.000000e+00 : f32
    %110 = vector.broadcast %cst_54 : f32 to vector<1x128xf32>
    %111 = arith.maximumf %109, %110 : vector<1x128xf32>
    %cst_55 = arith.constant 9.99999974E-6 : f32
    %112 = vector.broadcast %cst_55 : f32 to vector<1x128xf32>
    %113 = arith.addf %111, %112 : vector<1x128xf32>
    %114 = math.rsqrt %113 : vector<1x128xf32>
    %115 = arith.mulf %97, %114 : vector<1x128xf32>
    %116 = arith.mulf %105, %115 : vector<1x128xf32>
    %117 = arith.subf %98, %116 : vector<1x128xf32>
    %118 = arith.truncf %96 : vector<8x128xf32> to vector<8x128xbf16>
    %119 = arith.truncf %115 : vector<1x128xf32> to vector<1x128xbf16>
    %120 = vector.broadcast %119 : vector<1x128xbf16> to vector<8x128xbf16>
    %121 = arith.mulf %118, %120 : vector<8x128xbf16>
    %122 = arith.truncf %117 : vector<1x128xf32> to vector<1x128xbf16>
    %123 = vector.broadcast %122 : vector<1x128xbf16> to vector<8x128xbf16>
    %124 = arith.addf %121, %123 : vector<8x128xbf16>
    %c4_56 = arith.constant 4 : index
    %c0_57 = arith.constant 0 : index
    %c0_58 = arith.constant 0 : index
    %125 = vector.load %arg1[%c4_56, %c0_57, %c0_58] : memref<6x128x128xbf16, #tpu.memory_space<vmem>>, vector<1x128x128xbf16>
    %126 = vector.shape_cast %125 : vector<1x128x128xbf16> to vector<128x128xbf16>
    %c12 = arith.constant 12 : index
    %c0_59 = arith.constant 0 : index
    %127 = vector.load %arg2[%c12, %c0_59] : memref<18x128xf32, #tpu.memory_space<vmem>>, vector<1x128xf32>
    %cst_60 = arith.constant dense<0.000000e+00> : vector<8x128xf32>
    %128 = tpu.matmul %124, %126, %cst_60 {dimension_numbers = #tpu.dot_dimension_numbers<[1], [0], [0], [1], [0, 0, 1, 1], [], []>} : vector<8x128xbf16>, vector<128x128xbf16>, vector<8x128xf32> -> vector<8x128xf32>
    %129 = vector.broadcast %127 : vector<1x128xf32> to vector<8x128xf32>
    %130 = arith.addf %128, %129 : vector<8x128xf32>
    %cst_61 = arith.constant 0.000000e+00 : f32
    %131 = vector.broadcast %cst_61 : f32 to vector<8x128xf32>
    %132 = arith.maximumf %130, %131 : vector<8x128xf32>
    %c13 = arith.constant 13 : index
    %c0_62 = arith.constant 0 : index
    %133 = vector.load %arg2[%c13, %c0_62] : memref<18x128xf32, #tpu.memory_space<vmem>>, vector<1x128xf32>
    %c14 = arith.constant 14 : index
    %c0_63 = arith.constant 0 : index
    %134 = vector.load %arg2[%c14, %c0_63] : memref<18x128xf32, #tpu.memory_space<vmem>>, vector<1x128xf32>
    %cst_64 = arith.constant dense<0.000000e+00> : vector<128xf32>
    %135 = vector.multi_reduction <add>, %132, %cst_64 [0] : vector<8x128xf32> to vector<128xf32>
    %136 = vector.shape_cast %135 : vector<128xf32> to vector<1x128xf32>
    %137 = arith.mulf %132, %132 : vector<8x128xf32>
    %cst_65 = arith.constant dense<0.000000e+00> : vector<128xf32>
    %138 = vector.multi_reduction <add>, %137, %cst_65 [0] : vector<8x128xf32> to vector<128xf32>
    %139 = vector.shape_cast %138 : vector<128xf32> to vector<1x128xf32>
    %cst_66 = arith.constant 1.250000e-01 : f32
    %140 = vector.broadcast %cst_66 : f32 to vector<1x128xf32>
    %141 = arith.mulf %136, %140 : vector<1x128xf32>
    %cst_67 = arith.constant 1.250000e-01 : f32
    %142 = vector.broadcast %cst_67 : f32 to vector<1x128xf32>
    %143 = arith.mulf %139, %142 : vector<1x128xf32>
    %144 = arith.mulf %141, %141 : vector<1x128xf32>
    %145 = arith.subf %143, %144 : vector<1x128xf32>
    %cst_68 = arith.constant 0.000000e+00 : f32
    %146 = vector.broadcast %cst_68 : f32 to vector<1x128xf32>
    %147 = arith.maximumf %145, %146 : vector<1x128xf32>
    %cst_69 = arith.constant 9.99999974E-6 : f32
    %148 = vector.broadcast %cst_69 : f32 to vector<1x128xf32>
    %149 = arith.addf %147, %148 : vector<1x128xf32>
    %150 = math.rsqrt %149 : vector<1x128xf32>
    %151 = arith.mulf %133, %150 : vector<1x128xf32>
    %152 = arith.mulf %141, %151 : vector<1x128xf32>
    %153 = arith.subf %134, %152 : vector<1x128xf32>
    %154 = arith.truncf %132 : vector<8x128xf32> to vector<8x128xbf16>
    %155 = arith.truncf %151 : vector<1x128xf32> to vector<1x128xbf16>
    %156 = vector.broadcast %155 : vector<1x128xbf16> to vector<8x128xbf16>
    %157 = arith.mulf %154, %156 : vector<8x128xbf16>
    %158 = arith.truncf %153 : vector<1x128xf32> to vector<1x128xbf16>
    %159 = vector.broadcast %158 : vector<1x128xbf16> to vector<8x128xbf16>
    %160 = arith.addf %157, %159 : vector<8x128xbf16>
    %c5_70 = arith.constant 5 : index
    %c0_71 = arith.constant 0 : index
    %c0_72 = arith.constant 0 : index
    %161 = vector.load %arg1[%c5_70, %c0_71, %c0_72] : memref<6x128x128xbf16, #tpu.memory_space<vmem>>, vector<1x128x128xbf16>
    %162 = vector.shape_cast %161 : vector<1x128x128xbf16> to vector<128x128xbf16>
    %c15 = arith.constant 15 : index
    %c0_73 = arith.constant 0 : index
    %163 = vector.load %arg2[%c15, %c0_73] : memref<18x128xf32, #tpu.memory_space<vmem>>, vector<1x128xf32>
    %cst_74 = arith.constant dense<0.000000e+00> : vector<8x128xf32>
    %164 = tpu.matmul %160, %162, %cst_74 {dimension_numbers = #tpu.dot_dimension_numbers<[1], [0], [0], [1], [0, 0, 1, 1], [], []>} : vector<8x128xbf16>, vector<128x128xbf16>, vector<8x128xf32> -> vector<8x128xf32>
    %165 = vector.broadcast %163 : vector<1x128xf32> to vector<8x128xf32>
    %166 = arith.addf %164, %165 : vector<8x128xf32>
    %c0_75 = arith.constant 0 : index
    %c0_76 = arith.constant 0 : index
    %167 = vector.load %arg4[%c0_75, %c0_76] : memref<8x128xf32, #tpu.memory_space<vmem>>, vector<8x128xf32>
    tpu.vector_store %arg4[%c0_75, %c0_76], %166 {strides = array<i32>} : memref<8x128xf32, #tpu.memory_space<vmem>>, vector<8x128xf32>,
    return
  }
}

</mosaic_0001>

<bundles_post_ra>
// kernel: _fused_forward.1
= control target key start
LH: loop header
LB: loop body
LE: loop exit
PB: predicated region body
PF: predicated region fallthrough
CT: control target
= control target key end

     0   :  { %10 = vsyncpa [#allocation4], 0  ;;  %s1245_s0 = inlined_call_operand.hbm [shape: f32[8,16], index: 0, kind: input, shape index: {}]   ;;  %s1246_s1 = inlined_call_operand.hbm [shape: bf16[6,128,128], index: 1, kind: input, shape index: {}]   ;;  %s1247_s2 = inlined_call_operand.hbm [shape: f32[18,128], index: 2, kind: input, shape index: {}]   ;;  %s1248_s3 = inlined_call_operand.hbm [shape: f32[8,128], index: 3, kind: output, shape index: {0}]   ;;  %s1249_s4 = inlined_call_operand.hbm [shape: f32[8,128], index: 4, kind: output, shape index: {1}]  }
   0x1   :  { %11 = vsyncpa [#allocation7], 0 }
   0x2   :  { %12 = vsyncpa [#allocation5], 0  ;;  %s29_s17 = sshll.u32 %s1246_s1, 4  ;;  %s30_s17 = int_to_ptr.hbm [resolvable:$true] %s29_s17 }
   0x3   :  { %13 = vsyncpa [#allocation11], 0  ;;  %s1195_s18 = smov [#allocation6]   ;;  %s19_s22 = sshll.u32 %s1245_s0, 4  ;;  %s20_s22 = int_to_ptr.hbm [resolvable:$true] %s19_s22 }
   0x4   :  { %s31_s19 = sshll.u32 %s1195_s18, 4  ;;  %s1196_s23 = smov 64   ;;  %s32_s19 = int_to_ptr.vmem [resolvable:$true] %s31_s19 }
   0x5   :  { %s1197_s24 = smov 4   ;;  %s1198_s25 = smov [#allocation3]  }
   0x6   :  { %37 = dma.hbm_to_vmem [thread:$0]  %s30_s17, 6144, %s32_s19, [#allocation7], %s1196_s23, %s1196_s23, %s1197_s24  }
   0x7   :  { %s21_s26 = sshll.u32 %s1198_s25, 4  ;;  %s42_s29 = sshll.u32 %s1247_s2, 4  ;;  %s22_s26 = int_to_ptr.vmem [resolvable:$true] %s21_s26  ;;  %s43_s29 = int_to_ptr.hbm [resolvable:$true] %s42_s29 }
   0x8   :  { %24 = dma.hbm_to_vmem [thread:$0]  %s20_s22, 128, %s22_s26, [#allocation4]  }
   0x9   :  { %s1199_s1 = smov [#allocation8]   ;;  %s1200_s5 = smov 128  }
   0xa   :  { %s44_s30 = sshll.u32 %s1199_s1, 4  ;;  %s1201_s6 = smov 8   ;;  %s45_s30 = int_to_ptr.vmem [resolvable:$true] %s44_s30 }
   0xb   :  { %50 = dma.hbm_to_vmem [thread:$0]  %s43_s29, 384, %s45_s30, [#allocation7], %s1200_s5, %s1200_s5, %s1201_s6  }
   0xc   :  { %1187 = dma.done.wait [#allocation4], 128  }
   0xd   :  { %1188 = vsyncadd [#allocation4], 4294967168 }
   0xe   :  { %1189 = dma.done.wait [#allocation7], 6528  }
   0xf   :  { %1190 = vsyncadd [#allocation7], 4294960768  ;;  %v1202_v0 = vmov 0.0   ;;  %v1002_v1 = vld [vmem:[#allocation6 + $0x38] sm:$0xff]  ;;  %vm65_vm0 = vcmask 130048   ;;  %v1001_v2 = vld [vmem:[#allocation6 + $0x30] sm:$0xff] }
  0x10   :  { %63 = vst [vmem:[#allocation2] sm:$0xff] %v1202_v0  ;;  %135 = vmatpush.bf16.msra.mxu0 %v1002_v1  ;;  %v64_v3 = vld [vmem:[#allocation3] sm:$0xff]  ;;  %v1000_v5 = vld [vmem:[#allocation6 + $0x28] sm:$0xff]  ;;  %v1009_v6 = vld [vmem:[#allocation6 + $0x70] sm:$0xff]  ;;  %s1203_s0 = smov [#allocation9]   ;;  %s776_s9 = sshll.u32 %s1248_s3, 4  ;;  %s777_s9 = int_to_ptr.hbm [resolvable:$true] %s776_s9 }
  0x11   :  { %66 = vst.msk [vmem:[#allocation2] sm:$0xff] %vm65_vm0, %v64_v3  ;;  %v1010_v4 = vld [vmem:[#allocation6 + $0x78] sm:$0xff]  ;;  %v1008_v7 = vld [vmem:[#allocation6 + $0x68] sm:$0xff]  ;;  %v999_v8 = vld [vmem:[#allocation6 + $0x20] sm:$0xff]  ;;  %s774_s2 = sshll.u32 %s1203_s0, 4  ;;  %s1204_s10 = smov [#allocation10]   ;;  %s775_s2 = int_to_ptr.vmem [resolvable:$true] %s774_s2 }
  0x12   :  { %217 = vmatpush.bf16.msra.mxu1 %v1010_v4  ;;  %v1007_v9 = vld [vmem:[#allocation6 + $0x60] sm:$0xff]  ;;  %v998_v10 = vld [vmem:[#allocation6 + $0x18] sm:$0xff]  ;;  %v997_v12 = vld [vmem:[#allocation6 + $0x10] sm:$0xff]  ;;  %s785_s11 = sshll.u32 %s1204_s10, 4  ;;  %s787_s14 = sshll.u32 %s1249_s4, 4  ;;  %s786_s11 = int_to_ptr.vmem [resolvable:$true] %s785_s11  ;;  %s788_s14 = int_to_ptr.hbm [resolvable:$true] %s787_s14 }
  0x13   :  { %v1006_v11 = vld [vmem:[#allocation6 + $0x58] sm:$0xff]  ;;  %v1005_v13 = vld [vmem:[#allocation6 + $0x50] sm:$0xff]  ;;  %v996_v14 = vld [vmem:[#allocation6 + $0x8] sm:$0xff] }
  0x14   :  { %136 = vmatpush.bf16.msra.mxu0 %v1001_v2  ;;  %v995_v15 = vld [vmem:[#allocation6] sm:$0xff]  ;;  %v1004_v18 = vld [vmem:[#allocation6 + $0x48] sm:$0xff]  ;;  %v1018_v26 = vld [vmem:[#allocation6 + $0xb8] sm:$0xff] }
  0x15   :  { %v1003_v19 = vld [vmem:[#allocation6 + $0x40] sm:$0xff]  ;;  %351 = vmatpush.bf16.msra.mxu2 %v1018_v26  ;;  %v1017_v27 = vld [vmem:[#allocation6 + $0xb0] sm:$0xff]  ;;  %v1016_v28 = vld [vmem:[#allocation6 + $0xa8] sm:$0xff] }
  0x16   :  { %218 = vmatpush.bf16.msra.mxu1 %v1009_v6  ;;  %v1053_v20 = vld [vmem:[#allocation8] ss:$0 sm:$0xff]  ;;  %v1054_v29 = vld [vmem:[#allocation8 + $0x3] ss:$0 sm:$0xff]  ;;  %v1014_v33 = vld [vmem:[#allocation6 + $0x98] sm:$0xff] }
  0x17   :  { %v1015_v30 = vld [vmem:[#allocation6 + $0xa0] sm:$0xff]  ;;  %v1013_v37 = vld [vmem:[#allocation6 + $0x90] sm:$0xff]  ;;  %v1012_v43 = vld [vmem:[#allocation6 + $0x88] sm:$0xff] }
  0x18   :  { %137 = vmatpush.bf16.msra.mxu0 %v1000_v5  ;;  %v67_v16 = vld [vmem:[#allocation2] sm:$0xff]  ;;  %v1011_v47 = vld [vmem:[#allocation6 + $0x80] sm:$0xff] }
  0x19   :  { %v85_v17 = vpack.c.bf16 %v67_v16, %v67_v16  ;;  %352 = vmatpush.bf16.msra.mxu2 %v1017_v27  ;;  %v231_v63 = vld [vmem:[#allocation8 + $0x4] sm:$0x1]  ;;  %v232_v3 = vld [vmem:[#allocation8 + $0x5] sm:$0x1] }
  0x1a   :  { %219 = vmatpush.bf16.msra.mxu1 %v1008_v7 }
  0x1c   :  { %138 = vmatpush.bf16.msra.mxu0 %v999_v8 }
  0x1d   :  { %353 = vmatpush.bf16.msra.mxu2 %v1016_v28  ;;  %v1022_v28 = vld [vmem:[#allocation6 + $0xd8] sm:$0xff] }
  0x1e   :  { %220 = vmatpush.bf16.msra.mxu1 %v1007_v9 }
  0x20   :  { %139 = vmatpush.bf16.msra.mxu0 %v998_v10 }
  0x21   :  { %354 = vmatpush.bf16.msra.mxu2 %v1015_v30 }
  0x22   :  { %221 = vmatpush.bf16.msra.mxu1 %v1006_v11 }
  0x24   :  { %140 = vmatpush.bf16.msra.mxu0 %v997_v12 }
  0x25   :  { %355 = vmatpush.bf16.msra.mxu2 %v1014_v33 }
  0x26   :  { %222 = vmatpush.bf16.msra.mxu1 %v1005_v13 }
  0x28   :  { %141 = vmatpush.bf16.msra.mxu0 %v996_v14 }
  0x29   :  { %356 = vmatpush.bf16.msra.mxu2 %v1013_v37 }
  0x2a   :  { %223 = vmatpush.bf16.msra.mxu1 %v1004_v18 }
  0x2c   :  { %142 = vmatpush.bf16.msra.mxu0 %v995_v15 }
  0x2d   :  { %357 = vmatpush.bf16.msra.mxu2 %v1012_v43 }
  0x2e   :  { %224 = vmatpush.bf16.msra.mxu1 %v1003_v19 }
  0x2f   :  { %143 = vmatmul.bf16.vlgmr.msra.gmra.mxu0 %v85_v17 }
  0x31   :  { %358 = vmatpush.bf16.msra.mxu2 %v1011_v47 }
  0xac   :  { %v144_v21 = vpop.f32.mrf.mxu0 }
  0xad   :  { %v145_v22 = vadd.f32 %v1053_v20, %v144_v21  ;;  %v1026_v21 = vld [vmem:[#allocation6 + $0xf8] sm:$0xff] }
  0xae   :  { %487 = vmatpush.bf16.msra.mxu3 %v1026_v21  ;;  %v1031_v21 = vld [vmem:[#allocation6 + $0x120] sm:$0xff] }
  0xaf   :  { %v148_v23 = vmax.f32 %v145_v22, 0.0  ;;  %v1025_v22 = vld [vmem:[#allocation6 + $0xf0] sm:$0xff] }
  0xb1   :  { %v149_v24 = vpack.c.bf16 %v148_v23, %v148_v23  ;;  %v1024_v23 = vld [vmem:[#allocation6 + $0xe8] sm:$0xff] }
  0xb2   :  { %488 = vmatpush.bf16.msra.mxu3 %v1025_v22 }
  0xb3   :  { %225 = vmatmul.bf16.vlgmr.msra.gmra.mxu1 %v149_v24  ;;  %v1055_v24 = vld [vmem:[#allocation8 + $0x6] ss:$0 sm:$0xff] }
  0xb4   :  { %v146_v25 = vpop.f32.mrf.mxu0 }
  0xb5   :  { %v1023_v25 = vld [vmem:[#allocation6 + $0xe0] sm:$0xff] }
  0xb6   :  { %489 = vmatpush.bf16.msra.mxu3 %v1024_v23 }
  0xba   :  { %490 = vmatpush.bf16.msra.mxu3 %v1023_v25 }
  0xbe   :  { %491 = vmatpush.bf16.msra.mxu3 %v1022_v28  ;;  %v1029_v28 = vld [vmem:[#allocation6 + $0x110] sm:$0xff] }
 0x130   :  { %v226_v31 = vpop.f32.mrf.mxu1 }
 0x131   :  { %v227_v32 = vadd.f32 %v1054_v29, %v226_v31 }
 0x133   :  { %v230_v34 = vmax.f32 %v227_v32, 0.0  ;;  %v1021_v32 = vld [vmem:[#allocation6 + $0xd0] sm:$0xff] }
 0x134   :  { %492 = vmatpush.bf16.msra.mxu3 %v1021_v32 }
 0x135   :  { %v233_v35 = vrot.slane %v230_v34, 4  ;;  %v239_v36 = vmul.f32 %v230_v34, %v230_v34  ;;  %v265_v7 = vpack.c.bf16 %v230_v34, %v230_v34 }
 0x137   :  { %v234_v38 = vadd.f32 %v233_v35, %v230_v34  ;;  %v240_v39 = vrot.slane %v239_v36, 4  ;;  %v271_v11 = vunpack.c.l.bf16 %v265_v7 }
 0x138   :  { %v228_v40 = vpop.f32.mrf.mxu1 }
 0x139   :  { %v235_v41 = vrot.slane %v234_v38, 2  ;;  %v241_v42 = vadd.f32 %v240_v39, %v239_v36 }
 0x13b   :  { %v236_v44 = vadd.f32 %v235_v41, %v234_v38  ;;  %v242_v45 = vrot.slane %v241_v42, 2  ;;  %v1020_v38 = vld [vmem:[#allocation6 + $0xc8] sm:$0xff] }
 0x13c   :  { %493 = vmatpush.bf16.msra.mxu3 %v1020_v38 }
 0x13d   :  { %v243_v46 = vadd.f32 %v242_v45, %v241_v42  ;;  %v237_v48 = vrot.slane %v236_v44, 1  ;;  %v1019_v42 = vld [vmem:[#allocation6 + $0xc0] sm:$0xff] }
 0x13f   :  { %v244_v49 = vrot.slane %v243_v46, 1  ;;  %v238_v50 = vadd.f32 %v237_v48, %v236_v44 }
 0x140   :  { %494 = vmatpush.bf16.msra.mxu3 %v1019_v42 }
 0x141   :  { %v245_v51 = vadd.f32 %v244_v49, %v243_v46  ;;  %v246_v52 = vmul.f32 0.125, %v238_v50 }
 0x143   :  { %v247_v53 = vmul.f32 0.125, %v245_v51  ;;  %v248_v54 = vmul.f32 %v246_v52, %v246_v52 }
 0x145   :  { %v249_v55 = vsub.f32 %v247_v53, %v248_v54 }
 0x147   :  { %v250_v56 = vmax.f32 %v249_v55, 0.0 }
 0x149   :  { %v251_v57 = vadd.f32 1e-05, %v250_v56 }
 0x14b   :  { %1059 = vrsqrt.f32 %v251_v57  ;;  %vm258_vm2 = vweird.f32 %v251_v57 }
 0x151   :  { %v1060_v58 = vpop.eup %1059 }
 0x152   :  { %v253_v59 = vmul.f32 %v1060_v58, %v251_v57  ;;  %vm259_vm1 = vweird.f32 %v1060_v58 }
 0x153   :  { %vm260_vm3 = vmor %vm258_vm2, %vm259_vm1 }
 0x154   :  { %v254_v60 = vmul.f32 %v1060_v58, %v253_v59 }
 0x156   :  { %v255_v61 = vmul.f32 0.5, %v254_v60 }
 0x158   :  { %v256_v62 = vsub.f32 1.5, %v255_v61 }
 0x15a   :  { %v257_v0 = vmul.f32 %v1060_v58, %v256_v62  ;;  %v366_v62 = vld [vmem:[#allocation8 + $0x8] sm:$0x1] }
 0x15c   :  { %v261_v1 = vsel %vm260_vm3, %v1060_v58, %v257_v0  ;;  %v365_v58 = vld [vmem:[#allocation8 + $0x7] sm:$0x1] }
 0x15d   :  { %v262_v2 = vmul.f32 %v261_v1, %v231_v63 }
 0x15f   :  { %v263_v4 = vmul.f32 %v262_v2, %v246_v52  ;;  %v266_v5 = vpack.c.bf16 %v262_v2, %v262_v2 }
 0x161   :  { %v264_v6 = vsub.f32 %v232_v3, %v263_v4  ;;  %v268_v8 = vpack.i.b16 %v266_v5, %v266_v5 }
 0x163   :  { %v270_v9 = vperm.slane %v268_v8, 0  ;;  %v275_v10 = vpack.c.bf16 %v264_v6, %v264_v6 }
 0x165   :  { %v272_v12 = vunpack.c.l.bf16 %v270_v9  ;;  %v277_v13 = vpack.i.b16 %v275_v10, %v275_v10 }
 0x167   :  { %v273_v14 = vmul.f32 %v272_v12, %v271_v11  ;;  %v279_v15 = vperm.slane %v277_v13, 0 }
 0x169   :  { %v274_v16 = vpack.c.bf16 %v273_v14, %v273_v14  ;;  %v281_v18 = vunpack.c.l.bf16 %v279_v15 }
 0x16b   :  { %v280_v17 = vunpack.c.l.bf16 %v274_v16 }
 0x16d   :  { %v282_v19 = vadd.f32 %v281_v18, %v280_v17  ;;  %v1034_v17 = vld [vmem:[#allocation6 + $0x138] sm:$0xff]  ;;  %v1033_v18 = vld [vmem:[#allocation6 + $0x130] sm:$0xff] }
 0x16e   :  { %621 = vmatpush.bf16.msrb.mxu0 %v1034_v17 }
 0x16f   :  { %v283_v20 = vpack.c.bf16 %v282_v19, %v282_v19  ;;  %v1032_v19 = vld [vmem:[#allocation6 + $0x128] sm:$0xff] }
 0x171   :  { %359 = vmatmul.bf16.vlgmr.msra.gmra.mxu2 %v283_v20  ;;  %v1056_v20 = vld [vmem:[#allocation8 + $0x9] ss:$0 sm:$0xff] }
 0x172   :  { %622 = vmatpush.bf16.msrb.mxu0 %v1033_v18 }
 0x176   :  { %623 = vmatpush.bf16.msrb.mxu0 %v1032_v19  ;;  %v1038_v19 = vld [vmem:[#allocation6 + $0x158] sm:$0xff] }
 0x17a   :  { %624 = vmatpush.bf16.msrb.mxu0 %v1031_v21 }
 0x1f4   :  { %v360_v26 = vpop.f32.mrf.mxu2 }
 0x1f5   :  { %v361_v27 = vadd.f32 %v1055_v24, %v360_v26  ;;  %v1030_v24 = vld [vmem:[#allocation6 + $0x118] sm:$0xff] }
 0x1f6   :  { %625 = vmatpush.bf16.msrb.mxu0 %v1030_v24 }
 0x1f7   :  { %v364_v29 = vmax.f32 %v361_v27, 0.0 }
 0x1f9   :  { %v367_v30 = vrot.slane %v364_v29, 4  ;;  %v373_v31 = vmul.f32 %v364_v29, %v364_v29  ;;  %v399_v2 = vpack.c.bf16 %v364_v29, %v364_v29 }
 0x1fa   :  { %626 = vmatpush.bf16.msrb.mxu0 %v1029_v28 }
 0x1fb   :  { %v368_v33 = vadd.f32 %v367_v30, %v364_v29  ;;  %v374_v34 = vrot.slane %v373_v31, 4  ;;  %v405_v6 = vunpack.c.l.bf16 %v399_v2 }
 0x1fc   :  { %v362_v35 = vpop.f32.mrf.mxu2 }
 0x1fd   :  { %v369_v36 = vrot.slane %v368_v33, 2  ;;  %v375_v37 = vadd.f32 %v374_v34, %v373_v31  ;;  %v1028_v34 = vld [vmem:[#allocation6 + $0x108] sm:$0xff] }
 0x1fe   :  { %627 = vmatpush.bf16.msrb.mxu0 %v1028_v34  ;;  %v1035_v34 = vld [vmem:[#allocation6 + $0x140] sm:$0xff] }
 0x1ff   :  { %v370_v39 = vadd.f32 %v369_v36, %v368_v33  ;;  %v376_v40 = vrot.slane %v375_v37, 2 }
 0x201   :  { %v377_v41 = vadd.f32 %v376_v40, %v375_v37  ;;  %v371_v43 = vrot.slane %v370_v39, 1 }
 0x203   :  { %v378_v44 = vrot.slane %v377_v41, 1  ;;  %v372_v45 = vadd.f32 %v371_v43, %v370_v39  ;;  %v1027_v39 = vld [vmem:[#allocation6 + $0x100] sm:$0xff] }
 0x204   :  { %628 = vmatpush.bf16.msrb.mxu0 %v1027_v39 }
 0x205   :  { %v379_v46 = vadd.f32 %v378_v44, %v377_v41  ;;  %v380_v47 = vmul.f32 0.125, %v372_v45 }
 0x207   :  { %v381_v48 = vmul.f32 0.125, %v379_v46  ;;  %v382_v49 = vmul.f32 %v380_v47, %v380_v47 }
 0x209   :  { %v383_v50 = vsub.f32 %v381_v48, %v382_v49 }
 0x20b   :  { %v384_v51 = vmax.f32 %v383_v50, 0.0 }
 0x20d   :  { %v385_v52 = vadd.f32 1e-05, %v384_v51 }
 0x20f   :  { %1061 = vrsqrt.f32 %v385_v52  ;;  %vm392_vm5 = vweird.f32 %v385_v52 }
 0x215   :  { %v1062_v53 = vpop.eup %1061 }
 0x216   :  { %v387_v54 = vmul.f32 %v1062_v53, %v385_v52  ;;  %vm393_vm4 = vweird.f32 %v1062_v53 }
 0x217   :  { %vm394_vm6 = vmor %vm392_vm5, %vm393_vm4 }
 0x218   :  { %v388_v55 = vmul.f32 %v1062_v53, %v387_v54  ;;  %v501_v54 = vld [vmem:[#allocation8 + $0xa] sm:$0x1] }
 0x21a   :  { %v389_v56 = vmul.f32 0.5, %v388_v55 }
 0x21c   :  { %v390_v57 = vsub.f32 1.5, %v389_v56 }
 0x21e   :  { %v391_v59 = vmul.f32 %v1062_v53, %v390_v57 }
 0x220   :  { %v395_v60 = vsel %vm394_vm6, %v1062_v53, %v391_v59 }
 0x221   :  { %v396_v61 = vmul.f32 %v395_v60, %v365_v58  ;;  %v502_v58 = vld [vmem:[#allocation8 + $0xb] sm:$0x1] }
 0x223   :  { %v397_v63 = vmul.f32 %v396_v61, %v380_v47  ;;  %v400_v0 = vpack.c.bf16 %v396_v61, %v396_v61 }
 0x225   :  { %v398_v1 = vsub.f32 %v366_v62, %v397_v63  ;;  %v402_v3 = vpack.i.b16 %v400_v0, %v400_v0 }
 0x227   :  { %v404_v4 = vperm.slane %v402_v3, 0  ;;  %v409_v5 = vpack.c.bf16 %v398_v1, %v398_v1 }
 0x229   :  { %v406_v7 = vunpack.c.l.bf16 %v404_v4  ;;  %v411_v8 = vpack.i.b16 %v409_v5, %v409_v5 }
 0x22b   :  { %v407_v9 = vmul.f32 %v406_v7, %v405_v6  ;;  %v413_v10 = vperm.slane %v411_v8, 0 }
 0x22d   :  { %v408_v11 = vpack.c.bf16 %v407_v9, %v407_v9  ;;  %v415_v13 = vunpack.c.l.bf16 %v413_v10 }
 0x22f   :  { %v414_v12 = vunpack.c.l.bf16 %v408_v11 }
 0x231   :  { %v416_v14 = vadd.f32 %v415_v13, %v414_v12  ;;  %v1042_v12 = vld [vmem:[#allocation6 + $0x178] sm:$0xff]  ;;  %v1041_v13 = vld [vmem:[#allocation6 + $0x170] sm:$0xff] }
 0x232   :  { %755 = vmatpush.bf16.msrb.mxu1 %v1042_v12 }
 0x233   :  { %v417_v15 = vpack.c.bf16 %v416_v14, %v416_v14  ;;  %v1040_v14 = vld [vmem:[#allocation6 + $0x168] sm:$0xff] }
 0x235   :  { %v418_v16 = vunpack.c.l.bf16 %v417_v15  ;;  %495 = vmatmul.bf16.vlgmr.msra.gmra.mxu3 %v417_v15  ;;  %v1057_v15 = vld [vmem:[#allocation8 + $0xc] ss:$0 sm:$0xff] }
 0x236   :  { %756 = vmatpush.bf16.msrb.mxu1 %v1041_v13 }
 0x237   :  { %419 = vst [vmem:[#allocation9] sm:$0xff] %v418_v16  ;;  %v1039_v16 = vld [vmem:[#allocation6 + $0x160] sm:$0xff] }
 0x238   :  { %779 = dma.vmem_to_hbm [thread:$0]  %s775_s2, 128, %s777_s9, [#allocation5]  }
 0x23a   :  { %757 = vmatpush.bf16.msrb.mxu1 %v1040_v14 }
 0x23e   :  { %758 = vmatpush.bf16.msrb.mxu1 %v1039_v16 }
 0x242   :  { %759 = vmatpush.bf16.msrb.mxu1 %v1038_v19 }
 0x2b8   :  { %v496_v22 = vpop.f32.mrf.mxu3 }
 0x2b9   :  { %v497_v23 = vadd.f32 %v1056_v20, %v496_v22 }
 0x2bb   :  { %v500_v25 = vmax.f32 %v497_v23, 0.0  ;;  %v1037_v23 = vld [vmem:[#allocation6 + $0x150] sm:$0xff] }
 0x2bc   :  { %760 = vmatpush.bf16.msrb.mxu1 %v1037_v23 }
 0x2bd   :  { %v503_v26 = vrot.slane %v500_v25, 4  ;;  %v509_v27 = vmul.f32 %v500_v25, %v500_v25  ;;  %v535_v61 = vpack.c.bf16 %v500_v25, %v500_v25 }
 0x2bf   :  { %v504_v29 = vadd.f32 %v503_v26, %v500_v25  ;;  %v510_v30 = vrot.slane %v509_v27, 4  ;;  %v541_v2 = vunpack.c.l.bf16 %v535_v61 }
 0x2c0   :  { %v498_v31 = vpop.f32.mrf.mxu3 }
 0x2c1   :  { %v505_v32 = vrot.slane %v504_v29, 2  ;;  %v511_v33 = vadd.f32 %v510_v30, %v509_v27 }
 0x2c3   :  { %v506_v35 = vadd.f32 %v505_v32, %v504_v29  ;;  %v512_v36 = vrot.slane %v511_v33, 2  ;;  %v1036_v29 = vld [vmem:[#allocation6 + $0x148] sm:$0xff] }
 0x2c4   :  { %761 = vmatpush.bf16.msrb.mxu1 %v1036_v29 }
 0x2c5   :  { %v507_v37 = vrot.slane %v506_v35, 1  ;;  %v513_v38 = vadd.f32 %v512_v36, %v511_v33 }
 0x2c7   :  { %v514_v40 = vrot.slane %v513_v38, 1  ;;  %v508_v41 = vadd.f32 %v507_v37, %v506_v35 }
 0x2c8   :  { %762 = vmatpush.bf16.msrb.mxu1 %v1035_v34 }
 0x2c9   :  { %v515_v42 = vadd.f32 %v514_v40, %v513_v38  ;;  %v516_v43 = vmul.f32 0.125, %v508_v41 }
 0x2cb   :  { %v517_v44 = vmul.f32 0.125, %v515_v42  ;;  %v518_v45 = vmul.f32 %v516_v43, %v516_v43 }
 0x2cd   :  { %v519_v46 = vsub.f32 %v517_v44, %v518_v45 }
 0x2cf   :  { %v520_v47 = vmax.f32 %v519_v46, 0.0 }
 0x2d1   :  { %v521_v48 = vadd.f32 1e-05, %v520_v47 }
 0x2d3   :  { %1063 = vrsqrt.f32 %v521_v48  ;;  %vm528_vm8 = vweird.f32 %v521_v48 }
 0x2d9   :  { %v1064_v49 = vpop.eup %1063 }
 0x2da   :  { %v523_v50 = vmul.f32 %v1064_v49, %v521_v48  ;;  %vm529_vm7 = vweird.f32 %v1064_v49 }
 0x2db   :  { %vm530_vm9 = vmor %vm528_vm8, %vm529_vm7 }
 0x2dc   :  { %v524_v51 = vmul.f32 %v1064_v49, %v523_v50 }
 0x2de   :  { %v525_v52 = vmul.f32 0.5, %v524_v51 }
 0x2e0   :  { %v526_v53 = vsub.f32 1.5, %v525_v52 }
 0x2e2   :  { %v527_v55 = vmul.f32 %v1064_v49, %v526_v53  ;;  %v636_v53 = vld [vmem:[#allocation8 + $0xe] sm:$0x1] }
 0x2e4   :  { %v531_v56 = vsel %vm530_vm9, %v1064_v49, %v527_v55  ;;  %v635_v49 = vld [vmem:[#allocation8 + $0xd] sm:$0x1] }
 0x2e5   :  { %v532_v57 = vmul.f32 %v531_v56, %v501_v54 }
 0x2e7   :  { %v533_v59 = vmul.f32 %v532_v57, %v516_v43  ;;  %v536_v60 = vpack.c.bf16 %v532_v57, %v532_v57 }
 0x2e9   :  { %v534_v62 = vsub.f32 %v502_v58, %v533_v59  ;;  %v538_v63 = vpack.i.b16 %v536_v60, %v536_v60 }
 0x2eb   :  { %v540_v0 = vperm.slane %v538_v63, 0  ;;  %v545_v1 = vpack.c.bf16 %v534_v62, %v534_v62 }
 0x2ed   :  { %v542_v3 = vunpack.c.l.bf16 %v540_v0  ;;  %v547_v4 = vpack.i.b16 %v545_v1, %v545_v1 }
 0x2ef   :  { %v543_v5 = vmul.f32 %v542_v3, %v541_v2  ;;  %v549_v6 = vperm.slane %v547_v4, 0 }
 0x2f1   :  { %v544_v7 = vpack.c.bf16 %v543_v5, %v543_v5  ;;  %v551_v9 = vunpack.c.l.bf16 %v549_v6 }
 0x2f3   :  { %v550_v8 = vunpack.c.l.bf16 %v544_v7  ;;  %v1058_v7 = vld [vmem:[#allocation8 + $0xf] ss:$0 sm:$0xff] }
 0x2f5   :  { %v552_v10 = vadd.f32 %v551_v9, %v550_v8 }
 0x2f7   :  { %v553_v11 = vpack.c.bf16 %v552_v10, %v552_v10 }
 0x2f9   :  { %629 = vmatmul.bf16.vlgmr.msrb.gmra.mxu0 %v553_v11 }
 0x376   :  { %v630_v17 = vpop.f32.mrf.mxu0 }
 0x377   :  { %v631_v18 = vadd.f32 %v1057_v15, %v630_v17 }
 0x379   :  { %v634_v20 = vmax.f32 %v631_v18, 0.0 }
 0x37b   :  { %v637_v21 = vrot.slane %v634_v20, 4  ;;  %v643_v22 = vmul.f32 %v634_v20, %v634_v20  ;;  %v669_v56 = vpack.c.bf16 %v634_v20, %v634_v20 }
 0x37d   :  { %v638_v24 = vadd.f32 %v637_v21, %v634_v20  ;;  %v644_v25 = vrot.slane %v643_v22, 4  ;;  %v675_v61 = vunpack.c.l.bf16 %v669_v56 }
 0x37e   :  { %v632_v26 = vpop.f32.mrf.mxu0 }
 0x37f   :  { %v639_v27 = vrot.slane %v638_v24, 2  ;;  %v645_v28 = vadd.f32 %v644_v25, %v643_v22 }
 0x381   :  { %v640_v30 = vadd.f32 %v639_v27, %v638_v24  ;;  %v646_v31 = vrot.slane %v645_v28, 2 }
 0x383   :  { %v641_v32 = vrot.slane %v640_v30, 1  ;;  %v647_v33 = vadd.f32 %v646_v31, %v645_v28 }
 0x385   :  { %v648_v35 = vrot.slane %v647_v33, 1  ;;  %v642_v36 = vadd.f32 %v641_v32, %v640_v30 }
 0x387   :  { %v649_v37 = vadd.f32 %v648_v35, %v647_v33  ;;  %v650_v38 = vmul.f32 0.125, %v642_v36 }
 0x389   :  { %v651_v39 = vmul.f32 0.125, %v649_v37  ;;  %v652_v40 = vmul.f32 %v650_v38, %v650_v38 }
 0x38b   :  { %v653_v41 = vsub.f32 %v651_v39, %v652_v40 }
 0x38d   :  { %v654_v42 = vmax.f32 %v653_v41, 0.0 }
 0x38f   :  { %v655_v43 = vadd.f32 1e-05, %v654_v42 }
 0x391   :  { %1065 = vrsqrt.f32 %v655_v43  ;;  %vm662_vm11 = vweird.f32 %v655_v43 }
 0x397   :  { %v1066_v44 = vpop.eup %1065 }
 0x398   :  { %v657_v45 = vmul.f32 %v1066_v44, %v655_v43  ;;  %vm663_vm10 = vweird.f32 %v1066_v44 }
 0x399   :  { %vm664_vm12 = vmor %vm662_vm11, %vm663_vm10 }
 0x39a   :  { %v658_v46 = vmul.f32 %v1066_v44, %v657_v45 }
 0x39c   :  { %v659_v47 = vmul.f32 0.5, %v658_v46 }
 0x39e   :  { %v660_v48 = vsub.f32 1.5, %v659_v47 }
 0x3a0   :  { %v661_v50 = vmul.f32 %v1066_v44, %v660_v48 }
 0x3a2   :  { %v665_v51 = vsel %vm664_vm12, %v1066_v44, %v661_v50 }
 0x3a3   :  { %v666_v52 = vmul.f32 %v665_v51, %v635_v49 }
 0x3a5   :  { %v667_v54 = vmul.f32 %v666_v52, %v650_v38  ;;  %v670_v55 = vpack.c.bf16 %v666_v52, %v666_v52 }
 0x3a7   :  { %v668_v57 = vsub.f32 %v636_v53, %v667_v54  ;;  %v672_v58 = vpack.i.b16 %v670_v55, %v670_v55 }
 0x3a9   :  { %v674_v59 = vperm.slane %v672_v58, 0  ;;  %v679_v60 = vpack.c.bf16 %v668_v57, %v668_v57 }
 0x3ab   :  { %v676_v62 = vunpack.c.l.bf16 %v674_v59  ;;  %v681_v63 = vpack.i.b16 %v679_v60, %v679_v60 }
 0x3ad   :  { %v677_v0 = vmul.f32 %v676_v62, %v675_v61  ;;  %v683_v1 = vperm.slane %v681_v63, 0 }
 0x3af   :  { %v678_v2 = vpack.c.bf16 %v677_v0, %v677_v0  ;;  %v685_v4 = vunpack.c.l.bf16 %v683_v1 }
 0x3b1   :  { %v684_v3 = vunpack.c.l.bf16 %v678_v2 }
 0x3b3   :  { %v686_v5 = vadd.f32 %v685_v4, %v684_v3 }
 0x3b5   :  { %v687_v6 = vpack.c.bf16 %v686_v5, %v686_v5 }
 0x3b7   :  { %763 = vmatmul.bf16.vlgmr.msrb.gmra.mxu1 %v687_v6 }
 0x434   :  { %v764_v8 = vpop.f32.mrf.mxu1 }
 0x435   :  { %v765_v9 = vadd.f32 %v1058_v7, %v764_v8 }
 0x437   :  { %768 = vst [vmem:[#allocation10] sm:$0xff] %v765_v9 }
 0x438   :  { %790 = dma.vmem_to_hbm [thread:$0]  %s786_s11, 128, %s788_s14, [#allocation11]  }
 0x43c   :  { %v766_v10 = vpop.f32.mrf.mxu1 }
 0x43d   :  { %1191 = dma.done.wait [#allocation5], 128  }
 0x43e   :  { %1192 = vsyncadd [#allocation5], 4294967168 }
 0x43f   :  { %1193 = dma.done.wait [#allocation11], 128  }
 0x440   :  { %1194 = vsyncadd [#allocation11], 4294967168 }
 0x441   :  { %799 = vsyncpa [#allocation4], 1 }
 0x442   :  { %800 = vsyncpa [#allocation7], 1 }
 0x443   :  { %801 = vsyncpa [#allocation5], 1 }
 0x444   :  { %802 = vsyncpa [#allocation11], 1 }

</bundles_post_ra>
